<compile_context>
chip_gen: v7x
topology: tpu7x:2x2x1
jax: 0.10.0
libtpu: 0.0.40
codegen_flags: <defaults>
</compile_context>

<pallas_src>
import functools

import jax
import jax.numpy as jnp
from jax.experimental import pallas as pl
from jax.experimental.pallas import tpu as pltpu

BN_EPS = 1e-3


# --------------------------------------------------------------------------- kernel
def _downsample_kernel(x_ref, halo_ref, wmask_ref, w_ref, bconv_ref, *rest,
                       TH, Wq, Cin, Cconv, use_maxpool):
    """One (batch, H-tile) grid step, fully fused in VMEM.

    x_ref    : (1, 2, 2, Cin, L)  parity-split channels-first tile,
               x_ref[0, p, s, c, q*Wq + r] = x[c, 2*(q0+q)+p, 2*r+s],  L = TH*Wq
    halo_ref : (1, 1, 2, Cin, Wq) odd parity row just above this tile (zeros for tile 0)
    wmask_ref: (1, L) {0,1}, zero where r == 0 (left zero-padding of the kx=0 taps)
    w_ref    : (Cconv, 9*Cin)     conv weights, BN scale pre-folded, K-order = (ky, kx, c)
    bconv_ref: (Cconv, 1) f32     BN bias of the conv channels
    """
    if use_maxpool:
        spool_ref, bpool_ref, out_ref = rest
    else:
        (out_ref,) = rest

    L = TH * Wq
    cdt = x_ref.dtype

    # Four parity slabs of this tile, each (Cin, L); lanes = flattened (q, r).
    A0 = x_ref[0, 0, 0]          # even rows, even cols  -> tap (ky=1, kx=1)
    A1 = x_ref[0, 0, 1]          # even rows, odd  cols  -> tap (ky=1, kx=2)
    B0 = x_ref[0, 1, 0]          # odd  rows, even cols  -> tap (ky=2, kx=1)
    B1 = x_ref[0, 1, 1]          # odd  rows, odd  cols  -> tap (ky=2, kx=2)
    h0 = halo_ref[0, 0, 0]       # (Cin, Wq) halo row, even cols
    h1 = halo_ref[0, 0, 1]       # (Cin, Wq) halo row, odd  cols
    wmask = wmask_ref[...]       # (1, L)

    zcol = jnp.zeros((Cin, 1), cdt)

    def shift_w(a):              # column tap r-1 (zero at r == 0): lane shift by 1 + mask
        return wmask * jnp.concatenate([zcol, a[:, :L - 1]], axis=1)

    def shift_q(a, h):           # row tap q-1: lane shift by Wq; first row spliced from halo
        return jnp.concatenate([h, a[:, :L - Wq]], axis=1)

    A1w = shift_w(A1)
    B1w = shift_w(B1)
    h1w = jnp.concatenate([zcol, h1[:, :Wq - 1]], axis=1)

    # im2col: one (9*Cin, L) slab -> a single MXU contraction (K = 9*Cin), so the
    # summation over the 9 taps happens inside the MXU instead of 9 accumulator passes.
    patches = jnp.concatenate([
        shift_q(B1w, h1w),       # (ky=0, kx=0)
        shift_q(B0, h0),         # (ky=0, kx=1)
        shift_q(B1, h1),         # (ky=0, kx=2)
        A1w,                     # (ky=1, kx=0)
        A0,                      # (ky=1, kx=1)
        A1,                      # (ky=1, kx=2)
        B1w,                     # (ky=2, kx=0)
        B0,                      # (ky=2, kx=1)
        B1,                      # (ky=2, kx=2)
    ], axis=0)

    conv = jnp.dot(w_ref[...], patches, preferred_element_type=jnp.float32)  # (Cconv, L)
    conv = jnp.maximum(conv + bconv_ref[...], 0.0)                           # BN bias + relu

    if use_maxpool:
        out_ref[0, :Cconv, :] = conv.astype(out_ref.dtype)
        # 2x2/2 max-pool == max of the four parity slabs; BN + relu on pooled channels.
        pool = jnp.maximum(jnp.maximum(A0, A1), jnp.maximum(B0, B1)).astype(jnp.float32)
        pool = jnp.maximum(pool * spool_ref[...] + bpool_ref[...], 0.0)
        out_ref[0, Cconv:, :] = pool.astype(out_ref.dtype)
    else:
        out_ref[0] = conv.astype(out_ref.dtype)


# --------------------------------------------------------------------------- wrapper
def _pick_row_tile(Hq, Wq, Cin, Cout, itemsize, vmem_budget=8 << 20):
    """Largest H-tile (in output rows) whose per-step working set fits the budget.
    Lane constraint: TH*Wq must be a multiple of 128 unless TH == Hq (whole image)."""
    def workset(th):
        L = th * Wq
        io = 2 * (4 * Cin + Cout) * L * itemsize               # double-buffered in/out tiles
        tmp = 14 * Cin * L * itemsize + (Cout + Cin) * L * 4   # im2col + shifted slabs + f32 epilogue
        return io + tmp
    cands = [d for d in range(1, Hq + 1)
             if Hq % d == 0 and (d == Hq or (d * Wq) % 128 == 0)]
    fitting = [d for d in cands if workset(d) <= vmem_budget]
    return max(fitting) if fitting else min(cands)


def _make_halo(x_nchw, TH, dtype):
    """halo[n, t, s, c, r] = x[n, c, 2*t*TH - 1, 2*r + s]   (zeros for t == 0)."""
    N, C, H, W = x_nchw.shape
    Hq, Wq = H // 2, W // 2
    nT = Hq // TH
    zero = jnp.zeros((N, 1, 2, C, Wq), dtype)
    if nT == 1:
        return zero
    rows = x_nchw[:, :, 2 * TH - 1: H - 1: 2 * TH, :]           # (N, C, nT-1, W)
    rows = rows.reshape(N, C, nT - 1, Wq, 2)
    rows = jnp.transpose(rows, (0, 2, 4, 1, 3)).astype(dtype)   # (N, nT-1, 2, C, Wq)
    return jnp.concatenate([zero, rows], axis=1)


def downsample(x_nchw, params, out_channels, *, compute_dtype=jnp.bfloat16,
               out_dtype=None, row_tile=None):
    """NCHW in, NCHW out.  Input side: one fused parity-split transpose.
    Output side: the kernel writes NCHW directly (only a free reshape here)."""
    N, Cin, H, W = x_nchw.shape
    assert H % 2 == 0 and W % 2 == 0, "module assumes even spatial dims"
    use_maxpool = Cin < out_channels
    Cconv = out_channels - Cin if use_maxpool else out_channels
    Cout = out_channels
    Hq, Wq = H // 2, W // 2
    out_dtype = compute_dtype if out_dtype is None else out_dtype
    itemsize = jnp.dtype(compute_dtype).itemsize

    TH = row_tile if row_tile is not None else _pick_row_tile(Hq, Wq, Cin, Cout, itemsize)
    assert Hq % TH == 0, "row_tile must divide H//2"
    assert TH == Hq or (TH * Wq) % 128 == 0, \
        "tile lane width (row_tile * W//2) must be a multiple of 128 (or cover the image)"
    nT = Hq // TH
    L = TH * Wq

    # Single fused layout pass: NCHW -> parity-split channels-first
    # xs[n, p, s, c, q*Wq + r] = x[n, c, 2q + p, 2r + s]
    xs = jnp.transpose(x_nchw.reshape(N, Cin, Hq, 2, Wq, 2), (0, 3, 5, 1, 2, 4))
    xs = xs.reshape(N, 2, 2, Cin, Hq * Wq).astype(compute_dtype)
    halo = _make_halo(x_nchw, TH, compute_dtype)                # (N, nT, 2, Cin, Wq) -- tiny
    wmask = (jnp.arange(L) % Wq != 0).astype(compute_dtype).reshape(1, L)

    w2 = params["w_conv"].astype(compute_dtype)                 # (Cconv, 9*Cin), BN scale folded
    b_conv = params["b_conv"].astype(jnp.float32)               # (Cconv, 1)

    inputs = [xs, halo, wmask, w2, b_conv]
    in_specs = [
        pl.BlockSpec((1, 2, 2, Cin, L), lambda n, t: (n, 0, 0, 0, t)),
        pl.BlockSpec((1, 1, 2, Cin, Wq), lambda n, t: (n, t, 0, 0, 0)),
        pl.BlockSpec((1, L), lambda n, t: (0, 0)),
        pl.BlockSpec((Cconv, 9 * Cin), lambda n, t: (0, 0)),
        pl.BlockSpec((Cconv, 1), lambda n, t: (0, 0)),
    ]
    if use_maxpool:
        inputs += [params["s_pool"].astype(jnp.float32),
                   params["b_pool"].astype(jnp.float32)]
        in_specs += [pl.BlockSpec((Cin, 1), lambda n, t: (0, 0)),
                     pl.BlockSpec((Cin, 1), lambda n, t: (0, 0))]

    kernel = functools.partial(_downsample_kernel, TH=TH, Wq=Wq, Cin=Cin,
                               Cconv=Cconv, use_maxpool=use_maxpool)

    flops = 2 * N * Hq * Wq * 9 * Cin * Cconv + (3 * N * Hq * Wq * Cin if use_maxpool else 0)
    bytes_accessed = (xs.size * itemsize + halo.size * itemsize + w2.size * itemsize
                      + N * Cout * Hq * Wq * jnp.dtype(out_dtype).itemsize)
    tile_bytes = 2 * (4 * Cin + Cout) * L * itemsize            # double-buffered in/out tiles
    temp_bytes = 14 * Cin * L * itemsize + (Cout + Cin) * L * 4
    vmem_limit = int(min(48 << 20, max(16 << 20, 2 * (tile_bytes + temp_bytes))))

    out = pl.pallas_call(
        kernel,
        out_shape=jax.ShapeDtypeStruct((N, Cout, Hq * Wq), out_dtype),
        grid=(N, nT),
        in_specs=in_specs,
        out_specs=pl.BlockSpec((1, Cout, L), lambda n, t: (n, 0, t)),
        compiler_params=pltpu.CompilerParams(
            dimension_semantics=("parallel", "parallel"),
            vmem_limit_bytes=vmem_limit),
        cost_estimate=pl.CostEstimate(flops=flops, transcendentals=0,
                                      bytes_accessed=bytes_accessed),
    )(*inputs)

    return out.reshape(N, Cout, Hq, Wq)                         # free reshape: already NCHW


# --------------------------------------------------------------------------- params / reference
def make_params(key, in_channels, out_channels):
    """Deterministic params mirroring the PyTorch module (inference-mode BN, folded)."""
    use_maxpool = in_channels < out_channels
    Cconv = out_channels - in_channels if use_maxpool else out_channels
    k_w, k_g, k_b, k_m, k_v = jax.random.split(key, 5)

    w_oihw = jax.random.normal(k_w, (Cconv, in_channels, 3, 3), jnp.float32) * 0.2
    gamma = 1.0 + 0.3 * jax.random.normal(k_g, (out_channels,), jnp.float32)
    beta = 0.1 * jax.random.normal(k_b, (out_channels,), jnp.float32)
    mean = 0.1 * jax.random.normal(k_m, (out_channels,), jnp.float32)
    var = 0.5 + jax.random.uniform(k_v, (out_channels,), jnp.float32)

    inv = gamma / jnp.sqrt(var + BN_EPS)          # per-channel BN scale
    bias = beta - mean * inv                      # per-channel BN bias

    # Fold the BN scale of the conv-output channels into the weights; K-order (ky, kx, c)
    # must match the kernel's im2col concat order.
    w2 = jnp.transpose(w_oihw, (0, 2, 3, 1)).reshape(Cconv, 9 * in_channels)
    w2 = w2 * inv[:Cconv, None]

    params = {"w_conv": w2, "b_conv": bias[:Cconv].reshape(Cconv, 1)}
    if use_maxpool:
        params["s_pool"] = inv[Cconv:].reshape(in_channels, 1)
        params["b_pool"] = bias[Cconv:].reshape(in_channels, 1)

    torch_layout = {"w_oihw": w_oihw, "gamma": gamma, "beta": beta, "mean": mean, "var": var}
    return params, torch_layout


def reference_nchw(x, tl, in_channels, out_channels):
    """Pure-JAX reference mirroring the PyTorch forward (inference-mode BN)."""
    use_maxpool = in_channels < out_channels
    dn = ("NCHW", "OIHW", "NCHW")
    out = jax.lax.conv_general_dilated(
        x, tl["w_oihw"], window_strides=(2, 2), padding=[(1, 1), (1, 1)],
        dimension_numbers=dn, precision=jax.lax.Precision.HIGHEST)
    if use_maxpool:
        N, C, H, W = x.shape
        x_pool = x.reshape(N, C, H // 2, 2, W // 2, 2).max(axis=(3, 5))
        out = jnp.concatenate([out, x_pool], axis=1)
    inv = tl["gamma"] / jnp.sqrt(tl["var"] + BN_EPS)
    out = out * inv[None, :, None, None] + (tl["beta"] - tl["mean"] * inv)[None, :, None, None]
    return jax.nn.relu(out)


def _bf16_rounded(tl):
    tl2 = dict(tl)
    tl2["w_oihw"] = tl["w_oihw"].astype(jnp.bfloat16).astype(jnp.float32)
    return tl2


if __name__ == "__main__":
    key = jax.random.PRNGKey(0)
    kx1, kx2, kp1, kp2, kp3 = jax.random.split(key, 5)

    # ---- Branch 1: in < out (conv + maxpool concat), small spec shapes -------------
    N, Cin, H, W, Cout = 2, 4, 16, 16, 8
    x = jax.random.normal(kx1, (N, Cin, H, W), jnp.float32)
    params, tl = make_params(kp1, Cin, Cout)
    ref = reference_nchw(x, tl, Cin, Cout)

    # f32 compute path (checks tap indexing / pooling / BN folding)
    out_f32 = jax.block_until_ready(downsample(x, params, Cout, compute_dtype=jnp.float32))
    assert out_f32.shape == (N, Cout, H // 2, W // 2)
    assert jnp.allclose(out_f32, ref, rtol=2e-2, atol=2e-2), "mismatch (maxpool, f32)"

    # bf16 compute path (the fast configuration); compare vs a bf16-rounded-input reference
    out_bf16 = jax.block_until_ready(downsample(x, params, Cout, compute_dtype=jnp.bfloat16))
    ref_bf16 = reference_nchw(x.astype(jnp.bfloat16).astype(jnp.float32), _bf16_rounded(tl),
                              Cin, Cout)
    assert jnp.allclose(out_bf16.astype(jnp.float32), ref_bf16, rtol=6e-2, atol=6e-2), \
        "mismatch (maxpool, bf16)"

    # ---- Branch 2: in >= out (conv only) -------------------------------------------
    Cout2 = 4
    params2, tl2 = make_params(kp2, Cin, Cout2)
    out2 = jax.block_until_ready(downsample(x, params2, Cout2, compute_dtype=jnp.float32))
    ref2 = reference_nchw(x, tl2, Cin, Cout2)
    assert out2.shape == (N, Cout2, H // 2, W // 2)
    assert jnp.allclose(out2, ref2, rtol=2e-2, atol=2e-2), "mismatch (conv-only)"

    # ---- H-tiled path with halo (multi-step grid over H), bf16 ----------------------
    N3, Cin3, H3, W3, Cout3 = 1, 8, 64, 64, 16
    x3 = jax.random.normal(kx2, (N3, Cin3, H3, W3), jnp.float32)
    params3, tl3 = make_params(kp3, Cin3, Cout3)
    out3 = jax.block_until_ready(
        downsample(x3, params3, Cout3, compute_dtype=jnp.bfloat16, row_tile=8))
    ref3 = reference_nchw(x3.astype(jnp.bfloat16).astype(jnp.float32), _bf16_rounded(tl3),
                          Cin3, Cout3)
    assert out3.shape == (N3, Cout3, H3 // 2, W3 // 2)
    assert jnp.allclose(out3.astype(jnp.float32), ref3, rtol=6e-2, atol=6e-2), \
        "mismatch (tiled, bf16)"

    print("KERNEL_OK")
</pallas_src>

<mosaic_0001>
module attributes {stable_mosaic.version = 11 : i64} {
  func.func @_downsample_kernel(%arg0: i32, %arg1: i32, %arg2: memref<1x2x2x4x64xf32, #tpu.memory_space<vmem>>, %arg3: memref<1x1x2x4x8xf32, #tpu.memory_space<vmem>>, %arg4: memref<1x64xf32, #tpu.memory_space<vmem>>, %arg5: memref<4x36xf32, #tpu.memory_space<vmem>>, %arg6: memref<4x1xf32, #tpu.memory_space<vmem>>, %arg7: memref<4x1xf32, #tpu.memory_space<vmem>>, %arg8: memref<4x1xf32, #tpu.memory_space<vmem>>, %arg9: memref<1x8x64xf32, #tpu.memory_space<vmem>>) attributes {dimension_semantics = [#tpu.dimension_semantics<parallel>, #tpu.dimension_semantics<parallel>], iteration_bounds = array<i64: 2, 1>, scalar_prefetch = 0 : i64, scratch_operands = 0 : i64, tpu.core_type = #tpu.core_type<tc>, window_params = [{transform_indices = @transform_0, window_bounds = array<i64: 1, 2, 2, 4, 64>}, {transform_indices = @transform_1, window_bounds = array<i64: 1, 1, 2, 4, 8>}, {pipeline_mode = #tpu.pipeline_mode<synchronous>, transform_indices = @transform_2, window_bounds = array<i64: 1, 64>}, {pipeline_mode = #tpu.pipeline_mode<synchronous>, transform_indices = @transform_3, window_bounds = array<i64: 4, 36>}, {pipeline_mode = #tpu.pipeline_mode<synchronous>, transform_indices = @transform_4, window_bounds = array<i64: 4, 1>}, {pipeline_mode = #tpu.pipeline_mode<synchronous>, transform_indices = @transform_5, window_bounds = array<i64: 4, 1>}, {pipeline_mode = #tpu.pipeline_mode<synchronous>, transform_indices = @transform_6, window_bounds = array<i64: 4, 1>}, {transform_indices = @transform_7, window_bounds = array<i64: 1, 8, 64>}]} {
    %c0 = arith.constant 0 : index
    %c0_0 = arith.constant 0 : index
    %c0_1 = arith.constant 0 : index
    %c0_2 = arith.constant 0 : index
    %c0_3 = arith.constant 0 : index
    %0 = vector.load %arg2[%c0, %c0_0, %c0_1, %c0_2, %c0_3] : memref<1x2x2x4x64xf32, #tpu.memory_space<vmem>>, vector<1x1x1x4x64xf32>
    %1 = vector.shape_cast %0 : vector<1x1x1x4x64xf32> to vector<4x64xf32>
    %c0_4 = arith.constant 0 : index
    %c0_5 = arith.constant 0 : index
    %c1 = arith.constant 1 : index
    %c0_6 = arith.constant 0 : index
    %c0_7 = arith.constant 0 : index
    %2 = vector.load %arg2[%c0_4, %c0_5, %c1, %c0_6, %c0_7] : memref<1x2x2x4x64xf32, #tpu.memory_space<vmem>>, vector<1x1x1x4x64xf32>
    %3 = vector.shape_cast %2 : vector<1x1x1x4x64xf32> to vector<4x64xf32>
    %c0_8 = arith.constant 0 : index
    %c1_9 = arith.constant 1 : index
    %c0_10 = arith.constant 0 : index
    %c0_11 = arith.constant 0 : index
    %c0_12 = arith.constant 0 : index
    %4 = vector.load %arg2[%c0_8, %c1_9, %c0_10, %c0_11, %c0_12] : memref<1x2x2x4x64xf32, #tpu.memory_space<vmem>>, vector<1x1x1x4x64xf32>
    %5 = vector.shape_cast %4 : vector<1x1x1x4x64xf32> to vector<4x64xf32>
    %c0_13 = arith.constant 0 : index
    %c1_14 = arith.constant 1 : index
    %c1_15 = arith.constant 1 : index
    %c0_16 = arith.constant 0 : index
    %c0_17 = arith.constant 0 : index
    %6 = vector.load %arg2[%c0_13, %c1_14, %c1_15, %c0_16, %c0_17] : memref<1x2x2x4x64xf32, #tpu.memory_space<vmem>>, vector<1x1x1x4x64xf32>
    %7 = vector.shape_cast %6 : vector<1x1x1x4x64xf32> to vector<4x64xf32>
    %c0_18 = arith.constant 0 : index
    %c0_19 = arith.constant 0 : index
    %c0_20 = arith.constant 0 : index
    %c0_21 = arith.constant 0 : index
    %c0_22 = arith.constant 0 : index
    %8 = vector.load %arg3[%c0_18, %c0_19, %c0_20, %c0_21, %c0_22] : memref<1x1x2x4x8xf32, #tpu.memory_space<vmem>>, vector<1x1x1x4x8xf32>
    %9 = vector.shape_cast %8 : vector<1x1x1x4x8xf32> to vector<4x8xf32>
    %c0_23 = arith.constant 0 : index
    %c0_24 = arith.constant 0 : index
    %c1_25 = arith.constant 1 : index
    %c0_26 = arith.constant 0 : index
    %c0_27 = arith.constant 0 : index
    %10 = vector.load %arg3[%c0_23, %c0_24, %c1_25, %c0_26, %c0_27] : memref<1x1x2x4x8xf32, #tpu.memory_space<vmem>>, vector<1x1x1x4x8xf32>
    %11 = vector.shape_cast %10 : vector<1x1x1x4x8xf32> to vector<4x8xf32>
    %c0_28 = arith.constant 0 : index
    %c0_29 = arith.constant 0 : index
    %12 = vector.load %arg4[%c0_28, %c0_29] : memref<1x64xf32, #tpu.memory_space<vmem>>, vector<1x64xf32>
    %cst = arith.constant 0.000000e+00 : f32
    %13 = vector.broadcast %cst : f32 to vector<4x1xf32>
    %14 = vector.extract_strided_slice %3 {offsets = [0, 0], sizes = [4, 63], strides = [1, 1]} : vector<4x64xf32> to vector<4x63xf32>
    %15 = tpu.concatenate %13, %14 in 1 : vector<4x1xf32>, vector<4x63xf32> -> vector<4x64xf32>
    %16 = vector.broadcast %12 : vector<1x64xf32> to vector<4x64xf32>
    %17 = arith.mulf %16, %15 : vector<4x64xf32>
    %18 = vector.extract_strided_slice %7 {offsets = [0, 0], sizes = [4, 63], strides = [1, 1]} : vector<4x64xf32> to vector<4x63xf32>
    %19 = tpu.concatenate %13, %18 in 1 : vector<4x1xf32>, vector<4x63xf32> -> vector<4x64xf32>
    %20 = vector.broadcast %12 : vector<1x64xf32> to vector<4x64xf32>
    %21 = arith.mulf %20, %19 : vector<4x64xf32>
    %22 = vector.extract_strided_slice %11 {offsets = [0, 0], sizes = [4, 7], strides = [1, 1]} : vector<4x8xf32> to vector<4x7xf32>
    %23 = tpu.concatenate %13, %22 in 1 : vector<4x1xf32>, vector<4x7xf32> -> vector<4x8xf32>
    %24 = vector.extract_strided_slice %21 {offsets = [0, 0], sizes = [4, 56], strides = [1, 1]} : vector<4x64xf32> to vector<4x56xf32>
    %25 = tpu.concatenate %23, %24 in 1 : vector<4x8xf32>, vector<4x56xf32> -> vector<4x64xf32>
    %26 = vector.extract_strided_slice %5 {offsets = [0, 0], sizes = [4, 56], strides = [1, 1]} : vector<4x64xf32> to vector<4x56xf32>
    %27 = tpu.concatenate %9, %26 in 1 : vector<4x8xf32>, vector<4x56xf32> -> vector<4x64xf32>
    %28 = vector.extract_strided_slice %7 {offsets = [0, 0], sizes = [4, 56], strides = [1, 1]} : vector<4x64xf32> to vector<4x56xf32>
    %29 = tpu.concatenate %11, %28 in 1 : vector<4x8xf32>, vector<4x56xf32> -> vector<4x64xf32>
    %30 = tpu.concatenate %25, %27, %29, %17, %1, %3, %21, %5, %7 in 0 : vector<4x64xf32>, vector<4x64xf32>, vector<4x64xf32>, vector<4x64xf32>, vector<4x64xf32>, vector<4x64xf32>, vector<4x64xf32>, vector<4x64xf32>, vector<4x64xf32> -> vector<36x64xf32>
    %c0_30 = arith.constant 0 : index
    %c0_31 = arith.constant 0 : index
    %31 = vector.load %arg5[%c0_30, %c0_31] : memref<4x36xf32, #tpu.memory_space<vmem>>, vector<4x36xf32>
    %cst_32 = arith.constant dense<0.000000e+00> : vector<4x64xf32>
    %32 = tpu.matmul %31, %30, %cst_32 {dimension_numbers = #tpu.dot_dimension_numbers<[1], [0], [0], [1], [0, 0, 1, 1], [], []>} : vector<4x36xf32>, vector<36x64xf32>, vector<4x64xf32> -> vector<4x64xf32>
    %c0_33 = arith.constant 0 : index
    %c0_34 = arith.constant 0 : index
    %33 = vector.load %arg6[%c0_33, %c0_34] : memref<4x1xf32, #tpu.memory_space<vmem>>, vector<4x1xf32>
    %34 = vector.broadcast %33 : vector<4x1xf32> to vector<4x64xf32>
    %35 = arith.addf %32, %34 : vector<4x64xf32>
    %cst_35 = arith.constant 0.000000e+00 : f32
    %36 = vector.broadcast %cst_35 : f32 to vector<4x64xf32>
    %37 = arith.maximumf %35, %36 : vector<4x64xf32>
    %c0_36 = arith.constant 0 : index
    %c0_37 = arith.constant 0 : index
    %c0_38 = arith.constant 0 : index
    %38 = vector.load %arg9[%c0_36, %c0_37, %c0_38] : memref<1x8x64xf32, #tpu.memory_space<vmem>>, vector<1x4x64xf32>
    %39 = vector.shape_cast %38 : vector<1x4x64xf32> to vector<4x64xf32>
    %40 = vector.shape_cast %37 : vector<4x64xf32> to vector<1x4x64xf32>
    tpu.vector_store %arg9[%c0_36, %c0_37, %c0_38], %40 {strides = array<i32>} : memref<1x8x64xf32, #tpu.memory_space<vmem>>, vector<1x4x64xf32>,
    %41 = arith.maximumf %1, %3 : vector<4x64xf32>
    %42 = arith.maximumf %5, %7 : vector<4x64xf32>
    %43 = arith.maximumf %41, %42 : vector<4x64xf32>
    %c0_39 = arith.constant 0 : index
    %c0_40 = arith.constant 0 : index
    %44 = vector.load %arg7[%c0_39, %c0_40] : memref<4x1xf32, #tpu.memory_space<vmem>>, vector<4x1xf32>
    %45 = vector.broadcast %44 : vector<4x1xf32> to vector<4x64xf32>
    %46 = arith.mulf %43, %45 : vector<4x64xf32>
    %c0_41 = arith.constant 0 : index
    %c0_42 = arith.constant 0 : index
    %47 = vector.load %arg8[%c0_41, %c0_42] : memref<4x1xf32, #tpu.memory_space<vmem>>, vector<4x1xf32>
    %48 = vector.broadcast %47 : vector<4x1xf32> to vector<4x64xf32>
    %49 = arith.addf %46, %48 : vector<4x64xf32>
    %cst_43 = arith.constant 0.000000e+00 : f32
    %50 = vector.broadcast %cst_43 : f32 to vector<4x64xf32>
    %51 = arith.maximumf %49, %50 : vector<4x64xf32>
    %c0_44 = arith.constant 0 : index
    %c4 = arith.constant 4 : index
    %c0_45 = arith.constant 0 : index
    %52 = vector.load %arg9[%c0_44, %c4, %c0_45] : memref<1x8x64xf32, #tpu.memory_space<vmem>>, vector<1x4x64xf32>
    %53 = vector.shape_cast %52 : vector<1x4x64xf32> to vector<4x64xf32>
    %54 = vector.shape_cast %51 : vector<4x64xf32> to vector<1x4x64xf32>
    tpu.vector_store %arg9[%c0_44, %c4, %c0_45], %54 {strides = array<i32>} : memref<1x8x64xf32, #tpu.memory_space<vmem>>, vector<1x4x64xf32>,
    return
  }
  func.func @transform_0(%arg0: i32, %arg1: i32) -> (i32, i32, i32, i32, i32) {
    %c0_i32 = arith.constant 0 : i32
    %c0_i32_0 = arith.constant 0 : i32
    %c0_i32_1 = arith.constant 0 : i32
    %c0_i32_2 = arith.constant 0 : i32
    return %arg0, %c0_i32, %c0_i32_0, %c0_i32_1, %arg1 : i32, i32, i32, i32, i32
  }
  func.func @transform_1(%arg0: i32, %arg1: i32) -> (i32, i32, i32, i32, i32) {
    %c0_i32 = arith.constant 0 : i32
    %c0_i32_0 = arith.constant 0 : i32
    %c0_i32_1 = arith.constant 0 : i32
    %c0_i32_2 = arith.constant 0 : i32
    return %arg0, %arg1, %c0_i32, %c0_i32_0, %c0_i32_1 : i32, i32, i32, i32, i32
  }
  func.func @transform_2(%arg0: i32, %arg1: i32) -> (i32, i32) {
    %c0_i32 = arith.constant 0 : i32
    %c0_i32_0 = arith.constant 0 : i32
    %c0_i32_1 = arith.constant 0 : i32
    return %c0_i32, %c0_i32_0 : i32, i32
  }
  func.func @transform_3(%arg0: i32, %arg1: i32) -> (i32, i32) {
    %c0_i32 = arith.constant 0 : i32
    %c0_i32_0 = arith.constant 0 : i32
    %c0_i32_1 = arith.constant 0 : i32
    return %c0_i32, %c0_i32_0 : i32, i32
  }
  func.func @transform_4(%arg0: i32, %arg1: i32) -> (i32, i32) {
    %c0_i32 = arith.constant 0 : i32
    %c0_i32_0 = arith.constant 0 : i32
    %c0_i32_1 = arith.constant 0 : i32
    return %c0_i32, %c0_i32_0 : i32, i32
  }
  func.func @transform_5(%arg0: i32, %arg1: i32) -> (i32, i32) {
    %c0_i32 = arith.constant 0 : i32
    %c0_i32_0 = arith.constant 0 : i32
    %c0_i32_1 = arith.constant 0 : i32
    return %c0_i32, %c0_i32_0 : i32, i32
  }
  func.func @transform_6(%arg0: i32, %arg1: i32) -> (i32, i32) {
    %c0_i32 = arith.constant 0 : i32
    %c0_i32_0 = arith.constant 0 : i32
    %c0_i32_1 = arith.constant 0 : i32
    return %c0_i32, %c0_i32_0 : i32, i32
  }
  func.func @transform_7(%arg0: i32, %arg1: i32) -> (i32, i32, i32) {
    %c0_i32 = arith.constant 0 : i32
    %c0_i32_0 = arith.constant 0 : i32
    return %arg0, %c0_i32, %arg1 : i32, i32, i32
  }
}

</mosaic_0001>

<bundles_post_ra>
// kernel: tpu_custom_call.1
= control target key start
LH: loop header
LB: loop body
LE: loop exit
PB: predicated region body
PF: predicated region fallthrough
CT: control target
= control target key end

     0   :  { %12 = vsyncpa [#allocation3], 0  ;;  %s1273_s0 = inlined_call_operand.hbm [shape: f32[2,2,2,4,64], index: 0, kind: input, shape index: {}]   ;;  %s1274_s1 = inlined_call_operand.vmem [shape: f32[2,1,2,4,8], index: 1, kind: input, shape index: {}]   ;;  %s1275_s2 = inlined_call_operand.hbm [shape: f32[1,64], index: 2, kind: input, shape index: {}]   ;;  %s1276_s3 = inlined_call_operand.vmem [shape: f32[4,36], index: 3, kind: input, shape index: {}]   ;;  %s1277_s4 = inlined_call_operand.vmem [shape: f32[4,1], index: 4, kind: input, shape index: {}]   ;;  %s1278_s5 = inlined_call_operand.vmem [shape: f32[4,1], index: 5, kind: input, shape index: {}]   ;;  %s1279_s6 = inlined_call_operand.vmem [shape: f32[4,1], index: 6, kind: input, shape index: {}]   ;;  %s1280_s7 = inlined_call_operand.hbm [shape: f32[2,8,64], index: 7, kind: output, shape index: {}]  }
   0x1   :  { %14 = vsyncpa [#allocation3 + $0x1], 0 }
   0x2   :  { %15 = vsyncpa [#allocation6], 0 }
   0x3   :  { %16 = vsyncpa [#allocation4], 0 }
   0x4   :  { %18 = vsyncpa [#allocation4 + $0x1], 0  ;;  %s995_s24 = smov 0   ;;  %s997_s25 = smov 0  }
   0x5   :  { %s999_s26 = smov 0   ;;  %s1001_s27 = smov 0  }
   0x6   :  { %s1003_s28 = smov 0   ;;  %s1005_s29 = smov 0  }
   0x7 LB: > { %1290 = sst [smem:[#allocation11_spill]] %s942_s29  ;;  %s658_s30 = sadd.s32 4294967295, %s942_s29   ;;  %s942_s29 = sphi %s1005_s29, %s24_s29   ;;  %s938_s28 = sphi %s1003_s28, %s1316_s28   ;;  %s934_s27 = sphi %s1001_s27, %s1315_s27   ;;  %s930_s26 = sphi %s999_s26, %s1314_s26   ;;  %s926_s25 = sphi %s997_s25, %s1313_s25   ;;  %s922_s24 = sphi %s995_s24, %s1312_s24  }
   0x8   : > { %s659_s8 = sadd.s32 4294967294, %s942_s29   ;;  %p52_p0 = scmp.ne.s32.totalorder %s930_s26, %s926_s25 }
   0x9   : > { %p53_p1 = scmp.eq.s32.totalorder %s942_s29, 0  ;;  %p58_p2 = scmp.ne.s32.totalorder %s926_s25, %s922_s24 }
   0xa   : > { %p1033_p3 = scmp.eq.s32.totalorder %s658_s30, 0  ;;  %p217_p4 = scmp.eq.s32.totalorder %s658_s30, 1 }
   0xb   : > { %p1037_p5 = por %p53_p1, %p52_p0  ;;  %p223_p6 = scmp.eq.s32.totalorder %s659_s8, 1 }
   0xc   : > { %s1291_s10 = scalar_select %p1033_p3, 1, 0 }
   0xd   : > { %p1043_p7 = por %p1033_p3, %p58_p2  ;;  %p1047_p8 = por %p217_p4, %p52_p0 }
   0xe   : > { %p1051_p9 = por %p223_p6, %p58_p2  ;;  %p660_p10 = scmp.ge.s32.totalorder %s942_s29, 1 }
   0xf   : > { %s1293_s12 = scalar_select %p1043_p7, 1, 0 }
  0x10   : > { %s1294_s13 = scalar_select %p1047_p8, 1, 0 }
  0x11   : > { %s1295_s14 = scalar_select %p1051_p9, 1, 0 }
  0x12   : > { %p230_p11 = scmp.lt.s32.totalorder %s942_s29, 3  ;;  %s944_s16 = smov [#allocation5]  }
  0x13   : > { %1296 = sst [smem:[#allocation12_spill]] %s1295_s14  ;;  %s243_s17 = sshll.u32 %s944_s16, 4  ;;  %s244_s17 = int_to_ptr.vmem [resolvable:$true] %s243_s17 }
  0x14   : > { %p1058_p13 = pnand %p660_p10, %p230_p11  ;;  %p731_p1 = scmp.lt.s32.totalorder %s942_s29, 2 }
  0x15   : > { %s36_s20 = sadd.s32 1, %s938_s28  ;;  %s266_s22 = sand.u32 1, %s930_s26  }
  0x16   : > { %s1297_s15 = scalar_select %p1058_p13, 1, 0 }
  0x17   : > { %p718_p0 = pneg %p1058_p13  ;;  %p1067_p4 = pnand %p731_p1, %p1037_p5 }
  0x18   : > { %p1078_p6 = scmp.ge.s32.totalorder %s36_s20, 2  ;;  %s798_s8 = scalar_lea.hbm %s1275_s2, 16 }
  0x19   : > { %s1298_s18 = scalar_select %p1067_p4, 1, 0 }
  0x1a   : > { %p1073_p2 = pnand %p718_p0, %p1033_p3  ;;  %p799_p5 = scmp.ne.s32.totalorder %s1275_s2, %s798_s8 }
  0x1b   : > { %s1300_s21 = scalar_select %p1078_p6, 1, 0 }
  0x1c   : > { %p800_p10 = pneg %p1073_p2  ;;  %p805_p0 = scmp.lt.u32.totalorder %s798_s8, %s1275_s2 }
  0x1e   : > { %p801_p11 = pnand %p800_p10, %p799_p5 }
  0x20   : > { %p802_p1 = pneg %p801_p11 }
  0x22   : > { %p807_p12 = pnand %p805_p0, %p802_p1 }
  0x24   : > { %810 = shalt.err (!%p807_p12)
}
  0x25   : > { %s811_s14 = scalar_lea.vmem %s244_s17, 16  ;;  %s818_s23 = scalar_lea.vmem %s244_s17, 32 }
  0x26   : > { %p812_p9 = scmp.ne.s32.totalorder %s244_s17, %s811_s14  ;;  %p819_p7 = scmp.lt.s32.totalorder %s244_s17, %s244_s17 }
  0x27   : > { %p820_p13 = scmp.lt.s32.totalorder %s818_s23, %s811_s14 }
  0x28   : > { %p814_p8 = pnand %p812_p9, %p800_p10 }
  0x29   : > { %p821_p4 = por %p820_p13, %p819_p7 }
  0x2a   : > { %p815_p3 = pneg %p814_p8 }
  0x2c   : > { %p822_p6 = pnand %p821_p4, %p815_p3 }
  0x2e   : > { %825 = shalt.err (!%p822_p6)
}
  0x2f   : > { %721 = dma.hbm_to_vmem [thread:$0]  (!%p1073_p2), %s1275_s2, 16, %s244_s17, [#allocation6]  }
  0x30   : > { %p1301_p8 = scmp.ne.s32.totalorder %s1300_s21, 0  ;;  %s663_s29 = sshll.u32 %s266_s22, 4 }
  0x31   : > { %s683_s14 = sshll.u32 %s938_s28, 8  ;;  %s270_s23 = scalar_lea.vmem [#allocation2], %s663_s29 }
  0x32   : > { %s1318_s20 = smov (%p1301_p8, %s36_s20), 0  ;;  %s1111_s16 = scalar_lea.hbm %s1273_s0, %s683_s14 }
  0x33   : > { %s40_s9 = ssub.s32 %s938_s28, %s1318_s20  ;;  %s278_s17 = sshll.u32 %s270_s23, 4  ;;  %s1118_s17 = int_to_ptr.vmem [resolvable:$true] %s278_s17 }
  0x34   : > { %p43_p3 = scmp.eq.s32.totalorder %s40_s9, 0  ;;  %s1302_s21 = sadd.s32 1, %s930_s26 }
  0x35   : > { %s1122_s11 = scalar_lea.sflag [#allocation3], %s266_s22  ;;  %s826_s9 = scalar_lea.hbm %s1111_s16, 256 }
  0x36   : > { %s1116_s30 = scalar_select %p43_p3, %s930_s26, %s1302_s21  }
  0x37   : > { %p827_p7 = scmp.ne.s32.totalorder %s1111_s16, %s826_s9  ;;  %p1303_p9 = scmp.ne.s32.totalorder %s1298_s18, 0 }
  0x38   : > { %s831_s29 = scalar_lea.hbm %s1273_s0, 512  ;;  %p832_p2 = scmp.lt.u32.totalorder %s1111_s16, %s1273_s0 }
  0x39   : > { %p828_p12 = pneg %p1303_p9  ;;  %p833_p6 = scmp.lt.u32.totalorder %s831_s29, %s826_s9 }
  0x3a   : > { %p835_p10 = scmp.lt.u32.totalorder %s826_s9, %s1111_s16 }
  0x3b   : > { %p829_p13 = pnand %p828_p12, %p827_p7  ;;  %p834_p5 = por %p833_p6, %p832_p2 }
  0x3d   : > { %p830_p4 = pneg %p829_p13  ;;  %p836_p11 = por %p835_p10, %p834_p5 }
  0x3f   : > { %p837_p1 = pnand %p836_p11, %p830_p4 }
  0x41   : > { %840 = shalt.err (!%p837_p1)
}
  0x42   : > { %s841_s22 = scalar_lea.vmem %s1118_s17, 256  ;;  %s945_s21 = smov [#allocation2]  }
  0x43   : > { %p842_p0 = scmp.ne.s32.totalorder %s1118_s17, %s841_s22  ;;  %s846_s14 = sshll.u32 %s945_s21, 4  ;;  %s847_s14 = int_to_ptr.vmem [resolvable:$false] %s846_s14 }
  0x44   : > { %s848_s19 = scalar_lea.vmem %s847_s14, 512  ;;  %p849_p7 = scmp.lt.s32.totalorder %s1118_s17, %s847_s14 }
  0x45   : > { %p844_p8 = pnand %p842_p0, %p828_p12  ;;  %p850_p13 = scmp.lt.s32.totalorder %s848_s19, %s841_s22 }
  0x47   : > { %p845_p3 = pneg %p844_p8  ;;  %p851_p2 = por %p850_p13, %p849_p7 }
  0x49   : > { %p852_p6 = pnand %p851_p2, %p845_p3 }
  0x4b   : > { %855 = shalt.err (!%p852_p6)
}
  0x4c   : > { %s946_s9 = smov 64   ;;  %s947_s29 = smov 4  }
  0x4d   : > { %725 = dma.hbm_to_vmem [thread:$0]  (!%p1303_p9), %s1111_s16, 256, %s1118_s17, %s1122_s11, %s946_s9, %s946_s9, %s947_s29  }
  0x4e   : > { %p1304_p12 = scmp.ne.s32.totalorder %s1297_s15, 0 }
  0x4f   : > { %s1153_s8 = sand.u32 (!%p1304_p12), 1, %s926_s25   ;;  %p1305_p4 = scmp.ne.s32.totalorder (!%p1304_p12), %s1293_s12, 0 }
  0x50   : > { %302 = sbr.rel (%p1304_p12) target bundleno = 575 (0x23f), region = 48  ;;  %s667_s23 = sshll.u32 (!%p1304_p12), %s1153_s8, 4 }
  0x51   : > { %s305_s22 = scalar_lea.sflag (!%p1304_p12), [#allocation3], %s1153_s8  ;;  %s308_s21 = scalar_lea.vmem (!%p1304_p12), [#allocation2], %s667_s23 }
  0x57   : > { %909 = dma.done.wait (%p1305_p4), %s305_s22, 256  }
  0x58   : > { %911 = vsyncadd (%p1305_p4), %s305_s22, 4294967040  ;;  %p1306_p5 = scmp.ne.s32.totalorder %s1291_s10, 0 }
  0x5a   : > { %913 = dma.done.wait (%p1306_p5), [#allocation6], 16  }
  0x5b   : > { %915 = vsyncadd (%p1306_p5), [#allocation6], 4294967280  ;;  %v1165_v0 = vld [vmem:[%s308_s21 + $0xc] sm:$0xf]  ;;  %s948_s15 = smov 1   ;;  %s949_s10 = smov 8  }
  0x5c   : > { %386 = vrot.lane.b32.xlu0 %v1165_v0, %s948_s15  ;;  %v1169_v1 = vld [vmem:[%s308_s21 + $0x4] sm:$0xf]  ;;  %v1171_v2 = vld [vmem:[%s308_s21] sm:$0xf]  ;;  %p352_p9 = scmp.lt.s32.totalorder %s934_s27, 1  ;;  %vm376_vm0 = vcmask 7168  }
  0x5d   : > { %v512_v3 = vmax.f32 %v1171_v2, %v1169_v1  ;;  %v1179_v4 = vld [vmem:[%s308_s21 + $0x8] sm:$0xf]  ;;  %v417_v5 = vrot.slane %v1169_v1, 4  ;;  %v676_v6 = vld [vmem:[#allocation5] ss:$0 sm:$0xff]  ;;  %v950_v7 = vmov 0.0|0.0  }
  0x5e   : > { %s353_s12 = scalar_select %p352_p9, %s934_s27, 1  ;;  %704 = vmatprep.subr.bf16.mxu0 %v950_v7  ;;  %vm421_vm1 = vcmask 1043456   ;;  %v419_v9 = vrot.slane %v1179_v4, 4  ;;  %vm400_vm2 = vcmask 64512   ;;  %vm951_vm3 = vmmov 0  }
  0x5f   : > { %v424_v12 = vsel %vm421_vm1, %v1171_v2, %v417_v5  ;;  %v952_v24 = vmov 0.0   ;;  %v515_v25 = vld [vmem:[%s1278_s5] sm:$0xf]  ;;  %v953_v26 = vmov 0   ;;  %vm433_vm4 = vcmask 293888   ;;  %s532_s19 = scalar_lea.sflag [#allocation4], %s1153_s8 }
  0x60   : > { %373 = vrot.lane.b32.xlu0 %v1169_v1, %s948_s15  ;;  %s684_s18 = sshll.u32 %s353_s12, 3  ;;  %701 = vmatprep.mubr.msk.f32.mxu0 %vm951_vm3, %v952_v24  ;;  %v427_v27 = vld [vmem:[%s1277_s4] sm:$0xf]  ;;  %v513_v41 = vmax.f32 %v1179_v4, %v1165_v0  ;;  %vm510_vm5 = vcmask 519168   ;;  %p1307_p11 = scmp.ne.s32.totalorder %s1294_s13, 0 }
  0x61   : > { %s360_s11 = scalar_lea.vmem %s1274_s1, %s684_s18  ;;  %796 = vset.pattern.permute.xlu1 %v953_v26  ;;  %797 = vset.pattern.permute.xlu0 %v953_v26  ;;  %v522_v28 = vld [vmem:[%s1279_s6] sm:$0xf]  ;;  %s680_s18 = sshll.u32 %s934_s27, 7 }
  0x62   : > { %v675_v19 = vld [vmem:[%s360_s11 + $0x4] sm:$0xf]  ;;  %v368_v29 = vld [vmem:[%s360_s11] sm:$0xf]  ;;  %v514_v43 = vmax.f32 %v512_v3, %v513_v41  ;;  %s1224_s14 = scalar_lea.hbm %s1280_s7, %s680_s18  ;;  %s954_s27 = smov [#allocation7]  }
  0x63   : > { %v426_v40 = vld [vmem:[%s1276_s3] sm:$0xf]  ;;  %s860_s29 = sshll.u32 %s954_s27, 4  ;;  %s861_s29 = int_to_ptr.vmem [resolvable:$false] %s860_s29 }
  0x64   : > { %407 = vrot.lane.b32.xlu0 %v1165_v0, %s949_s10  ;;  %s862_s23 = scalar_lea.vmem %s861_s29, 256 }
  0x68   : > { %430 = vperm.xlu0 %797, %v427_v27  }
  0xce   : > { %v387_v8 = vpop.permute.xlu0 %386 }
  0xcf   : > { %v389_v10 = vsel %vm376_vm0, 0.0, %v387_v8 }
  0xd0   : > { %v390_v11 = vmul.f32 %v676_v6, %v389_v10 }
  0xd2   : > { %v791_v13 = vpack.i.bf16 %v390_v11, %v1179_v4  ;;  %v374_v14 = vpop.permute.xlu0 %373  ;;  %v425_v15 = vsel %vm421_vm1, %v390_v11, %v419_v9 }
  0xd3   : > { %v377_v16 = vsel %vm376_vm0, 0.0, %v374_v14  ;;  %v708_v17 = vpack.c.bf16 %v425_v15, %v424_v12 }
  0xd4   : > { %792 = vrot.lane.b32.xlu1 %v791_v13, %s949_s10  ;;  %v384_v18 = vmul.f32 %v676_v6, %v377_v16  ;;  %s669_s10 = sshll.u32 %s1153_s8, 3 }
  0xd5   : > { %s351_s12 = scalar_lea.vmem [#allocation7], %s669_s10 }
  0xd6   : > { %v415_v20 = vrot.slane %v384_v18, 4  ;;  %v408_v21 = vpop.permute.xlu0 %407  ;;  %s546_s16 = sshll.u32 %s351_s12, 4  ;;  %s1226_s16 = int_to_ptr.vmem [resolvable:$true] %s546_s16 }
  0xd7   : > { %v410_v22 = vsel %vm400_vm2, %v675_v19, %v408_v21  ;;  %s856_s9 = scalar_lea.vmem %s1226_s16, 128  ;;  %p863_p8 = scmp.lt.s32.totalorder %s1226_s16, %s861_s29 }
  0xd8   : > { %392 = vrot.lane.b32.xlu1 %v675_v19, %s948_s15  ;;  %v423_v23 = vsel %vm421_vm1, %v410_v22, %v415_v20  ;;  %p857_p10 = scmp.ne.s32.totalorder %s1226_s16, %s856_s9  ;;  %p864_p3 = scmp.lt.s32.totalorder %s862_s23, %s856_s9 }
  0xda   : > { %p858_p1 = pnand %p857_p10, %p1307_p11  ;;  %p865_p7 = por %p864_p3, %p863_p8 }
  0xdc   : > { %518 = vperm.xlu1 %796, %v515_v25   ;;  %p859_p0 = pneg %p858_p1 }
  0xde   : > { %p866_p13 = pnand %p865_p7, %p859_p0 }
  0xe0   : > { %525 = vperm.xlu1 %796, %v522_v28  }
  0xe7   : > { %v431_v48 = vpop.permute.xlu0 %430 }
 0x146   : > { %v793_v30 = vpop.permute.xlu1 %792 }
 0x147   : > { %v794_v31 = vunpack.i.l.bf16 %v793_v30  ;;  %v795_v33 = vunpack.i.h.bf16 %v793_v30 }
 0x149   : > { %v406_v32 = vsel %vm400_vm2, %v368_v29, %v794_v31 }
 0x14a   : > { %v393_v34 = vpop.permute.xlu1 %392  ;;  %v412_v35 = vrot.slane %v406_v32, 4 }
 0x14b   : > { %v395_v36 = vsel %vm376_vm0, 0.0, %v393_v34 }
 0x14c   : > { %v401_v37 = vsel %vm400_vm2, %v395_v36, %v795_v33 }
 0x14d   : > { %v422_v38 = vsel %vm421_vm1, %v401_v37, %v412_v35 }
 0x14e   : > { %v705_v39 = vpack.c.bf16 %v423_v23, %v422_v38 }
 0x150   : > { %706 = vmatpush3.bf16.msra.mxu0 %v705_v39 }
 0x151   : > { %707 = vmatprep.subr.bf16.mxu0 %v950_v7 }
 0x154   : > { %709 = vmatpush3.bf16.msra.mxu0 %v708_v17 }
 0x155   : > { %699 = vmatprep.subr.mxu0 %v952_v24 }
 0x158   : > { %700 = vmatpush3.msk.msra.mxu0 %vm421_vm1, %v1165_v0 }
 0x159   : > { %702 = vmatmul.mubr.msk.f32.vlgmr.msra.gmra.mrb[0].mxu0 %vm433_vm4, %v426_v40 }
 0x15b   : > { %v519_v42 = vpop.permute.xlu1 %518 }
 0x15c   : > { %v521_v44 = vmul.f32 %v519_v42, %v514_v43 }
 0x15f   : > { %v526_v45 = vpop.permute.xlu1 %525 }
 0x160   : > { %v528_v46 = vadd.f32 %v526_v45, %v521_v44 }
 0x162   : > { %v529_v47 = vmax.f32 %v528_v46, 0.0 }
 0x164   : > { %530 = vst.msk [vmem:[%s351_s12 + $0x4] sm:$0xf] %vm510_vm5, %v529_v47 }
 0x22c   : > { %v505_v49 = vpop.f32.mrb[0].mxu0 }
 0x22d   : > { %v506_v50 = vadd.f32 %v505_v49, %v431_v48  ;;  %v703_v51 = vpop.f32.mrb[1].mxu0 }
 0x22f   : > { %v509_v52 = vmax.f32 %v506_v50, 0.0 }
 0x231   : > { %511 = vst.msk [vmem:[%s351_s12] sm:$0xf] %vm510_vm5, %v509_v52 }
 0x232   : > { %869 = shalt.err (!%p866_p13)
}
 0x233   : > { %s870_s8 = scalar_lea.hbm %s1224_s14, 128  ;;  %s874_s15 = scalar_lea.hbm %s1280_s7, 256 }
 0x234   : > { %p871_p2 = scmp.ne.s32.totalorder %s1224_s14, %s870_s8  ;;  %p875_p4 = scmp.lt.u32.totalorder %s1224_s14, %s1280_s7 }
 0x235   : > { %p876_p5 = scmp.lt.u32.totalorder %s874_s15, %s870_s8  ;;  %p878_p10 = scmp.lt.u32.totalorder %s870_s8, %s1224_s14 }
 0x236   : > { %p872_p6 = pnand %p871_p2, %p1307_p11 }
 0x237   : > { %p877_p9 = por %p876_p5, %p875_p4 }
 0x238   : > { %p873_p12 = pneg %p872_p6 }
 0x239   : > { %p879_p1 = por %p878_p10, %p877_p9 }
 0x23b   : > { %p880_p0 = pnand %p879_p1, %p873_p12 }
 0x23d   : > { %883 = shalt.err (!%p880_p0)
}
 0x23e   : > { %716 = dma.vmem_to_hbm [thread:$0]  (%p1307_p11), %s1226_s16, 128, %s1224_s14, %s532_s19  }
 0x23f PF: > { %s1308_s18 = sld [smem:[#allocation12_spill]]  ;;  %s1309_s17 = sld [smem:[#allocation11_spill]] }
 0x240   : > { %s558_s11 = sand.u32 1, %s922_s24  }
 0x241   : > { %s559_s9 = scalar_lea.sflag [#allocation4], %s558_s11 }
 0x245   : > { %p1310_p8 = scmp.ne.s32.totalorder %s1308_s18, 0  ;;  %p1311_p3 = scmp.ge.s32.totalorder %s1309_s17, 2 }
 0x247   : > { %p727_p7 = pnand %p1311_p3, %p1310_p8 }
 0x249   : > { %917 = dma.done.wait (!%p727_p7), %s559_s9, 128  }
 0x24a   : > { %919 = vsyncadd (!%p727_p7), %s559_s9, 4294967168  ;;  %s24_s29 = sadd.s32 1, %s1309_s17   ;;  %s1312_s24 = smov %s926_s25 }
 0x24b   : > { %p21_p13 = scmp.ge.s32.totalorder %s24_s29, 4   ;;  %s1313_s25 = smov %s930_s26 }
 0x24c   : > { %s1314_s26 = smov %s1116_s30  ;;  %s1315_s27 = smov %s938_s28 }
 0x24d   : > { %s1316_s28 = smov %s1318_s20  ;;  %23 = sbr.rel (!%p21_p13) target bundleno = 7 (0x7), region = 104 }
 0x254   :  { %564 = vsyncpa [#allocation3], 1 }
 0x255   :  { %566 = vsyncpa [#allocation3 + $0x1], 1 }
 0x256   :  { %567 = vsyncpa [#allocation6], 1 }
 0x257   :  { %568 = vsyncpa [#allocation4], 1 }
 0x258   :  { %570 = vsyncpa [#allocation4 + $0x1], 1 }

</bundles_post_ra>
